<compile_context>
chip_gen: v6e
topology: v6e:2x2x1
jax: 0.10.0
libtpu: 0.0.40
codegen_flags: <defaults>
</compile_context>

<pallas_src>
import jax
import jax.numpy as jnp
from jax.experimental import pallas as pl
from jax.experimental.pallas import tpu as pltpu


def _bert_pooler_kernel(x_ref, w_ref, b_ref, out_ref):
    # x_ref : (TB, H)   first-token activations (caller dtype)
    # w_ref : (H, TN)   weight, pre-transposed to (in_features, out_features)
    # b_ref : (1, TN)   bias (f32)
    # out   : (TB, TN)
    x = x_ref[...].astype(w_ref.dtype)        # bf16 cast on the small tile only
    acc = jnp.dot(x, w_ref[...], preferred_element_type=jnp.float32)
    acc = acc + b_ref[...].astype(jnp.float32)
    out_ref[...] = jnp.tanh(acc).astype(out_ref.dtype)


def bert_pooler(hidden_states, w_dense, b_dense, *, tile_b=512, tile_n=256,
                compute_dtype=jnp.bfloat16):
    """BertPooler forward.

    hidden_states: (B, S, H)
    w_dense:       (H, H)  PyTorch nn.Linear weight (out_features, in_features)
    b_dense:       (H,)
    returns:       (B, H)  tanh(hidden_states[:, 0] @ w_dense.T + b_dense)
    """
    B, S, H = hidden_states.shape
    out_dtype = hidden_states.dtype

    # ---- first-token input without an extra HBM round-trip when possible ----
    if S == 1 or H % 128 == 0:
        # Free (bitcast) reshape: columns [0, H) of each (S*H)-wide row are
        # exactly token 0, so the BlockSpec below issues a strided DMA that
        # reads only B*H elements straight from HBM (no (B,H) copy op).
        x_in = hidden_states.reshape(B, S * H)
    else:
        # Unaligned H: last-dim block H would violate the 128-lane rule on the
        # reshaped view, so materialize the small (B, H) slab instead.
        x_in = hidden_states[:, 0, :]

    # One-time wrapper-side transpose + cast: canonical (K, N) MXU operand.
    w_t = w_dense.T.astype(compute_dtype)          # (H_in, H_out)
    b2d = b_dense.reshape(1, H).astype(jnp.float32)

    # ---- batch tiling ----
    tile_b = max(8, (tile_b // 8) * 8)             # keep tile a multiple of 8
    tb = B if B <= tile_b else tile_b              # full B is always legal
    nb = pl.cdiv(B, tb)

    # ---- output-feature tiling (only when the batch axis has one step) ----
    # Streams the weight in (H, tn) slabs so its DMA pipelines behind the
    # matmul and the parallel grid has >= 2 steps (feeds both v7x TCs).
    if nb == 1 and H > tile_n and tile_n % 128 == 0:
        tn = tile_n
    else:
        tn = H                                     # weight resident in VMEM
    nn = pl.cdiv(H, tn)

    grid = (nb, nn)

    return pl.pallas_call(
        _bert_pooler_kernel,
        out_shape=jax.ShapeDtypeStruct((B, H), out_dtype),
        grid=grid,
        in_specs=[
            # Activations: column-block 0 of the (reshaped) input == token 0.
            # Constant across j, so Pallas keeps the tile resident over the
            # feature axis instead of re-DMAing it.
            pl.BlockSpec((tb, H), lambda i, j: (i, 0)),
            # Weight slab (resident when nn == 1, streamed/pipelined otherwise).
            pl.BlockSpec((H, tn), lambda i, j: (0, j)),
            # Bias slab.
            pl.BlockSpec((1, tn), lambda i, j: (0, j)),
        ],
        out_specs=pl.BlockSpec((tb, tn), lambda i, j: (i, j)),
        compiler_params=pltpu.CompilerParams(
            dimension_semantics=("parallel", "parallel"),
            vmem_limit_bytes=48 * 1024 * 1024,
        ),
    )(x_in, w_t, b2d)


def _reference(hidden_states, w_dense, b_dense):
    return jnp.tanh(hidden_states[:, 0] @ w_dense.T + b_dense)


if __name__ == "__main__":
    key = jax.random.PRNGKey(0)

    pooler = jax.jit(
        bert_pooler, static_argnames=("tile_b", "tile_n", "compute_dtype"))

    cases = [
        # (B, S, H, kwargs)
        (2, 8, 32, {}),                 # unaligned H -> fallback slice path
        (4, 6, 128, {}),                # aligned H   -> strided first-token DMA
        (20, 4, 128, {"tile_b": 8}),    # multiple batch tiles, partial last tile
        (3, 4, 256, {"tile_n": 128}),   # single batch tile -> feature-tiled weight
    ]

    for idx, (B, S, H, kw) in enumerate(cases):
        k_hid, k_w, k_b, key = jax.random.split(key, 4)
        hidden = jax.random.normal(k_hid, (B, S, H), dtype=jnp.float32)
        w_dense = jax.random.normal(k_w, (H, H), dtype=jnp.float32) * 0.02
        b_dense = jax.random.normal(k_b, (H,), dtype=jnp.float32) * 0.02

        out = jax.block_until_ready(pooler(hidden, w_dense, b_dense, **kw))
        ref = _reference(hidden, w_dense, b_dense)

        assert out.shape == (B, H), (idx, out.shape)
        # bf16 MXU operands -> compare to the f32 reference at bf16 tolerance.
        assert jnp.allclose(out, ref, atol=2e-2, rtol=2e-2), (
            idx, float(jnp.max(jnp.abs(out - ref))))

    print("KERNEL_OK")
</pallas_src>

<mosaic_0001>
module attributes {stable_mosaic.version = 11 : i64} {
  func.func @_bert_pooler_kernel(%arg0: i32, %arg1: i32, %arg2: memref<2x32xf32, #tpu.memory_space<vmem>>, %arg3: memref<32x32xbf16, #tpu.memory_space<vmem>>, %arg4: memref<1x32xf32, #tpu.memory_space<vmem>>, %arg5: memref<2x32xf32, #tpu.memory_space<vmem>>) attributes {dimension_semantics = [#tpu.dimension_semantics<parallel>, #tpu.dimension_semantics<parallel>], iteration_bounds = array<i64: 1, 1>, scalar_prefetch = 0 : i64, scratch_operands = 0 : i64, tpu.core_type = #tpu.core_type<tc>, window_params = [{transform_indices = @transform_0, window_bounds = array<i64: 2, 32>}, {transform_indices = @transform_1, window_bounds = array<i64: 32, 32>}, {transform_indices = @transform_2, window_bounds = array<i64: 1, 32>}, {transform_indices = @transform_3, window_bounds = array<i64: 2, 32>}]} {
    %c0 = arith.constant 0 : index
    %c0_0 = arith.constant 0 : index
    %0 = vector.load %arg2[%c0, %c0_0] : memref<2x32xf32, #tpu.memory_space<vmem>>, vector<2x32xf32>
    %1 = arith.truncf %0 : vector<2x32xf32> to vector<2x32xbf16>
    %c0_1 = arith.constant 0 : index
    %c0_2 = arith.constant 0 : index
    %2 = vector.load %arg3[%c0_1, %c0_2] : memref<32x32xbf16, #tpu.memory_space<vmem>>, vector<32x32xbf16>
    %cst = arith.constant dense<0.000000e+00> : vector<2x32xf32>
    %3 = tpu.matmul %1, %2, %cst {dimension_numbers = #tpu.dot_dimension_numbers<[1], [0], [0], [1], [0, 0, 1, 1], [], []>} : vector<2x32xbf16>, vector<32x32xbf16>, vector<2x32xf32> -> vector<2x32xf32>
    %c0_3 = arith.constant 0 : index
    %c0_4 = arith.constant 0 : index
    %4 = vector.load %arg4[%c0_3, %c0_4] : memref<1x32xf32, #tpu.memory_space<vmem>>, vector<1x32xf32>
    %5 = vector.broadcast %4 : vector<1x32xf32> to vector<2x32xf32>
    %6 = arith.addf %3, %5 : vector<2x32xf32>
    %7 = math.tanh %6 : vector<2x32xf32>
    %c0_5 = arith.constant 0 : index
    %c0_6 = arith.constant 0 : index
    %8 = vector.load %arg5[%c0_5, %c0_6] : memref<2x32xf32, #tpu.memory_space<vmem>>, vector<2x32xf32>
    tpu.vector_store %arg5[%c0_5, %c0_6], %7 {strides = array<i32>} : memref<2x32xf32, #tpu.memory_space<vmem>>, vector<2x32xf32>,
    return
  }
  func.func @transform_0(%arg0: i32, %arg1: i32) -> (i32, i32) {
    %c0_i32 = arith.constant 0 : i32
    %c0_i32_0 = arith.constant 0 : i32
    return %arg0, %c0_i32 : i32, i32
  }
  func.func @transform_1(%arg0: i32, %arg1: i32) -> (i32, i32) {
    %c0_i32 = arith.constant 0 : i32
    %c0_i32_0 = arith.constant 0 : i32
    return %c0_i32, %arg1 : i32, i32
  }
  func.func @transform_2(%arg0: i32, %arg1: i32) -> (i32, i32) {
    %c0_i32 = arith.constant 0 : i32
    %c0_i32_0 = arith.constant 0 : i32
    return %c0_i32, %arg1 : i32, i32
  }
  func.func @transform_3(%arg0: i32, %arg1: i32) -> (i32, i32) {
    %c0_i32 = arith.constant 0 : i32
    return %arg0, %arg1 : i32, i32
  }
}

</mosaic_0001>

<bundles_post_ra>
// kernel: bert_pooler.1
= control target key start
LH: loop header
LB: loop body
LE: loop exit
PB: predicated region body
PF: predicated region fallthrough
CT: control target
= control target key end

     0   :  { %v146_v1 = vmov 0.0   ;;  %vm147_vm0 = vmmov 0   ;;  %s184_s0 = inlined_call_operand.vmem [shape: f32[2,32], index: 0, kind: input, shape index: {}]   ;;  %s185_s1 = inlined_call_operand.vmem [shape: bf16[32,32], index: 1, kind: input, shape index: {}]   ;;  %s186_s2 = inlined_call_operand.vmem [shape: f32[1,32], index: 2, kind: input, shape index: {}]   ;;  %s187_s3 = inlined_call_operand.hbm [shape: f32[2,32], index: 3, kind: output, shape index: {}]  }
   0x1   :  { %v120_v0 = vld [vmem:[%s185_s1 + $0x8] sm:$0xff]   ;;  %109 = vmatprep.subr.bf16.mxu0 %v146_v1  ;;  %v121_v2 = vld [vmem:[%s185_s1] sm:$0xff]   ;;  %113 = vmatprep.mubr.msk.bf16.mxu0 %vm147_vm0, %v146_v1 }
   0x2   :  { %110 = vmatpush3.bf16.msra.mxu0 %v120_v0  ;;  %v16_v3 = vld [vmem:[%s184_s0] sm:$0x3] }
   0x3   :  { %111 = vmatprep.subr.bf16.mxu0 %v146_v1 }
   0x4   :  { %8 = vsyncpa [#allocation3], 0  ;;  %v17_v4 = vpack.c.bf16 %v16_v3, %v16_v3  ;;  %vm41_vm1 = vcmask 261120   ;;  %v102_v5 = vld [vmem:[%s186_s2] ss:$0 sm:$0xff]  ;;  %s148_s1 = smov [#allocation2]  }
   0x5   :  { %s94_s20 = sshll.u32 %s148_s1, 4  ;;  %vm86_vm2 = vcmask 254976   ;;  %s95_s20 = int_to_ptr.vmem [resolvable:$true] %s94_s20 }
   0x6   :  { %112 = vmatpush3.bf16.msra.mxu0 %v121_v2  ;;  %s124_s0 = scalar_lea.vmem %s95_s20, 32  ;;  %p129_p1 = scmp.lt.s32.totalorder %s95_s20, %s95_s20 }
   0x7   :  { %p125_p0 = scmp.ne.s32.totalorder %s95_s20, %s124_s0  ;;  %p130_p2 = scmp.lt.s32.totalorder %s124_s0, %s124_s0 }
   0x9   :  { %114 = vmatmul.mubr.msk.bf16.vlgmr.msra.gmra.mxu0 %vm41_vm1, %v17_v4  ;;  %p131_p3 = por %p130_p2, %p129_p1 }
   0xb   :  { %p132_p4 = pnand %p131_p3, %p125_p0 }
  0xc9   :  { %v79_v6 = vpop.f32.mrf.mxu0 }
  0xca   :  { %v80_v7 = vadd.f32 %v102_v5, %v79_v6 }
  0xcb   :  { %v115_v8 = vpop.f32.mrf.mxu0 }
  0xcc   :  { %122 = vtanh.f32 %v80_v7 }
  0xcd   :  { %v82_v9 = vpop.f32.mrf.mxu0 }
  0xcf   :  { %v116_v10 = vpop.f32.mrf.mxu0 }
  0xd9   :  { %v123_v11 = vpop.eup %122 }
  0xda   :  { %87 = vst.msk [vmem:[#allocation2] sm:$0x3] %vm86_vm2, %v123_v11 }
  0xdb   :  { %135 = shalt.err (!%p132_p4)
}
  0xdc   :  { %97 = dma.vmem_to_hbm [thread:$0]  %s95_s20, 32, %s187_s3, [#allocation3]  }
  0xdd   :  { %144 = dma.done.wait [#allocation3], 32  }
  0xde   :  { %145 = vsyncadd [#allocation3], 4294967264 }
  0xdf   :  { %101 = vsyncpa [#allocation3], 1 }

</bundles_post_ra>
